<compile_context>
chip_gen: v6e
topology: v6e:2x2x1
jax: 0.10.0
libtpu: 0.0.40
codegen_flags: <defaults>
</compile_context>

<pallas_src>
import functools

import jax
import jax.numpy as jnp
from jax.experimental import pallas as pl
from jax.experimental.pallas import tpu as pltpu


# ---------------------------------------------------------------------------
# Pallas kernel: both Q-networks evaluated in one pass via packed weights.
# ---------------------------------------------------------------------------
def _critic_packed_kernel(x_ref, w1_ref, b1_ref, wh_ref, bh_ref,
                          wo_ref, bo_ref, out_ref, *, n_hidden_layers):
    w_dtype = w1_ref.dtype  # f32 or bf16; accumulation always f32.

    # Fused layer 1: single packed (tb, d_in) @ (d_in, 2H) matmul.
    x = x_ref[...].astype(w_dtype)
    h = jnp.dot(x, w1_ref[...], preferred_element_type=jnp.float32) + b1_ref[...]
    h = jnp.maximum(h, 0.0)

    # Shared hidden Linear applied n_hidden_layers times ([nn.Linear]*n
    # semantics).  VMEM loads and the bias broadcast are hoisted out of the
    # unrolled loop (JAX does not CSE broadcast_in_dim).
    wh = wh_ref[...]
    bh = jnp.broadcast_to(bh_ref[...], h.shape)
    for _ in range(n_hidden_layers):
        h = jnp.maximum(
            jnp.dot(h.astype(w_dtype), wh, preferred_element_type=jnp.float32) + bh,
            0.0)

    # Packed output head: (tb, 2H) @ (2H, 2) -> both Q values, single store.
    q = (jnp.dot(h.astype(w_dtype), wo_ref[...],
                 preferred_element_type=jnp.float32) + bo_ref[...])
    out_ref[...] = q.astype(out_ref.dtype)


# ---------------------------------------------------------------------------
# One-time parameter packing (keep this OUT of the per-step hot path).
# ---------------------------------------------------------------------------
def pack_critic_params(q1_params, q2_params, *, weight_dtype=jnp.float32):
    """Pack q1/q2 params into lane-concatenated / block-diagonal form.

    Weights are stored in `weight_dtype` (use jnp.bfloat16 for MXU-native
    operands at non-toy H); biases stay f32 so elementwise math is f32-only.
    """
    w1_1, b1_1, wh_1, bh_1, wo_1, bo_1 = q1_params
    w1_2, b1_2, wh_2, bh_2, wo_2, bo_2 = q2_params
    H = w1_1.shape[1]

    w1 = jnp.concatenate([w1_1, w1_2], axis=1).astype(weight_dtype)  # (d_in, 2H)
    b1 = jnp.concatenate([b1_1, b1_2], axis=1).astype(jnp.float32)   # (1, 2H)

    # Block-diagonal shared hidden weight.  Sub-MXU-tile for H=32 (saves a
    # push); for H >= 128 (v5e) / 256 (v6e/v7x) prefer a stacked (2, H, H)
    # weight + two dots to avoid 2x wasted MACs / bytes.
    wh = jnp.zeros((2 * H, 2 * H), weight_dtype)
    wh = (wh.at[:H, :H].set(wh_1.astype(weight_dtype))
            .at[H:, H:].set(wh_2.astype(weight_dtype)))              # (2H, 2H)
    bh = jnp.concatenate([bh_1, bh_2], axis=1).astype(jnp.float32)   # (1, 2H)

    wo = jnp.zeros((2 * H, 2), weight_dtype)
    wo = (wo.at[:H, 0:1].set(wo_1.astype(weight_dtype))
            .at[H:, 1:2].set(wo_2.astype(weight_dtype)))             # (2H, 2)
    bo = jnp.concatenate([bo_1, bo_2], axis=1).astype(jnp.float32)   # (1, 2)

    return (w1, b1, wh, bh, wo, bo)


# ---------------------------------------------------------------------------
# Forward wrappers.
# ---------------------------------------------------------------------------
_MAX_BATCH_TILE = 512  # activation tile rows once the batch grows (replay batches)


@functools.partial(jax.jit, static_argnames=("n_hidden_layers",))
def critic_forward_packed(state, action, packed_params, *, n_hidden_layers):
    """Returns the lane-packed (batch, 2) array [q1 | q2].

    Prefer consuming this directly (e.g. jnp.min(out, -1, keepdims=True) for
    the SAC TD target) instead of splitting into two (batch, 1) arrays.
    """
    w1, b1, wh, bh, wo, bo = packed_params
    batch = state.shape[0]
    d_in = state.shape[1] + action.shape[1]
    H2 = wh.shape[0]  # = 2 * hidden_dim

    # torch.cat([state, action], dim=-1): tiny XLA concat inside the same jit,
    # so the kernel's first layer is a single packed matmul.
    x = jnp.concatenate([state, action], axis=-1)

    # Batch tiling: whole batch in one step while small; tile + pipeline once
    # it grows.  Weight index_maps are constant, so weights are DMA'd once and
    # stay VMEM-resident across batch tiles.
    tb = batch if batch <= _MAX_BATCH_TILE else _MAX_BATCH_TILE
    padded = pl.cdiv(batch, tb) * tb
    if padded != batch:
        x = jnp.pad(x, ((0, padded - batch), (0, 0)))

    kernel = functools.partial(_critic_packed_kernel,
                               n_hidden_layers=n_hidden_layers)

    def act_spec(cols):
        return pl.BlockSpec((tb, cols), lambda i: (i, 0))

    def wgt_spec(shape2d):
        # Constant block index -> loaded once, no re-DMA across batch tiles.
        # (For large H on v7x: consider pipeline_mode=pl.Buffered(1) here to
        #  drop the pointless weight double-buffer and save VMEM.)
        return pl.BlockSpec(shape2d, lambda i: (0, 0))

    out = pl.pallas_call(
        kernel,
        out_shape=jax.ShapeDtypeStruct((padded, 2), jnp.float32),
        grid_spec=pltpu.PrefetchScalarGridSpec(
            num_scalar_prefetch=0,
            grid=(padded // tb,),
            in_specs=[
                act_spec(d_in),          # x = cat(state, action)
                wgt_spec((d_in, H2)),    # W1 packed
                wgt_spec((1, H2)),       # b1 packed
                wgt_spec((H2, H2)),      # Wh packed block-diag (shared layer)
                wgt_spec((1, H2)),       # bh packed
                wgt_spec((H2, 2)),       # Wo packed
                wgt_spec((1, 2)),        # bo packed
            ],
            out_specs=pl.BlockSpec((tb, 2), lambda i: (i, 0)),
        ),
        compiler_params=pltpu.CompilerParams(
            # Batch axis is fully parallel -> v7x shards it across its 2 TCs.
            dimension_semantics=("parallel",)),
    )(x, w1, b1, wh, bh, wo, bo)

    if padded != batch:
        out = out[:batch]
    return out


def critic_forward(state, action, packed_params, *, n_hidden_layers):
    """API-parity helper matching the PyTorch forward: returns (q1, q2)."""
    out = critic_forward_packed(state, action, packed_params,
                                n_hidden_layers=n_hidden_layers)
    return out[:, 0:1], out[:, 1:2]


# ---------------------------------------------------------------------------
# Deterministic parameter init (PyTorch Linear default: U(-1/sqrt(fan_in), ..))
# ---------------------------------------------------------------------------
def init_q_params(key, d_in, hidden):
    ks = jax.random.split(key, 6)

    def lin(kw, kb, fan_in, fan_out):
        bound = 1.0 / jnp.sqrt(fan_in)
        w = jax.random.uniform(kw, (fan_in, fan_out), jnp.float32, -bound, bound)
        b = jax.random.uniform(kb, (1, fan_out), jnp.float32, -bound, bound)
        return w, b

    w1, b1 = lin(ks[0], ks[1], d_in, hidden)
    wh, bh = lin(ks[2], ks[3], hidden, hidden)
    wo, bo = lin(ks[4], ks[5], hidden, 1)
    return (w1, b1, wh, bh, wo, bo)


# ---------------------------------------------------------------------------
# Pure-JAX reference for correctness check
# ---------------------------------------------------------------------------
def mlp_ref(x, params, n_hidden_layers):
    w1, b1, wh, bh, wo, bo = params
    h = jax.nn.relu(x @ w1 + b1)
    for _ in range(n_hidden_layers):
        h = jax.nn.relu(h @ wh + bh)
    return h @ wo + bo


if __name__ == "__main__":
    # Pendulum-v1: state_dim=3, action_dim=1; num_envs=8 -> batch=8
    batch, state_dim, action_dim = 8, 3, 1
    hidden_dim, n_hidden_layers = 32, 2

    key = jax.random.PRNGKey(0)
    k_state, k_action, k_params, k_big = jax.random.split(key, 4)

    state = jax.random.normal(k_state, (batch, state_dim), jnp.float32)
    action = jax.random.normal(k_action, (batch, action_dim), jnp.float32)

    q1_params = init_q_params(k_params, state_dim + action_dim, hidden_dim)
    # q2 = deepcopy(q1) in the PyTorch module -> identical initial parameters
    q2_params = tuple(jnp.array(p) for p in q1_params)

    # ---- f32 path (exact module semantics), env-step batch of 8 -------------
    packed_f32 = jax.block_until_ready(pack_critic_params(q1_params, q2_params))
    out = critic_forward_packed(state, action, packed_f32,
                                n_hidden_layers=n_hidden_layers)
    jax.block_until_ready(out)

    x = jnp.concatenate([state, action], axis=-1)
    ref = jnp.concatenate([mlp_ref(x, q1_params, n_hidden_layers),
                           mlp_ref(x, q2_params, n_hidden_layers)], axis=1)
    assert out.shape == (batch, 2)
    assert jnp.allclose(out, ref, atol=1e-5, rtol=1e-5)

    q1_out, q2_out = critic_forward(state, action, packed_f32,
                                    n_hidden_layers=n_hidden_layers)
    assert q1_out.shape == (batch, 1) and q2_out.shape == (batch, 1)
    assert jnp.allclose(q1_out, ref[:, 0:1], atol=1e-5, rtol=1e-5)
    assert jnp.allclose(q2_out, ref[:, 1:2], atol=1e-5, rtol=1e-5)

    # ---- bf16-weight path at a replay-buffer batch size ----------------------
    # Exercises the batch-tiled grid (grid=(2,), "parallel") and bf16 MXU
    # operands with f32 accumulation / f32 elementwise (v5e-safe).
    big_batch = 1024
    ks, ka = jax.random.split(k_big)
    big_state = jax.random.normal(ks, (big_batch, state_dim), jnp.float32)
    big_action = jax.random.normal(ka, (big_batch, action_dim), jnp.float32)

    packed_bf16 = jax.block_until_ready(
        pack_critic_params(q1_params, q2_params, weight_dtype=jnp.bfloat16))
    big_out = critic_forward_packed(big_state, big_action, packed_bf16,
                                    n_hidden_layers=n_hidden_layers)
    jax.block_until_ready(big_out)

    xb = jnp.concatenate([big_state, big_action], axis=-1)
    big_ref = jnp.concatenate([mlp_ref(xb, q1_params, n_hidden_layers),
                               mlp_ref(xb, q2_params, n_hidden_layers)], axis=1)
    assert big_out.shape == (big_batch, 2)
    # bf16 operands -> looser tolerance (accumulation stays f32).
    assert jnp.allclose(big_out, big_ref, atol=5e-2, rtol=5e-2)

    print("KERNEL_OK")
</pallas_src>

<mosaic_0001>
module attributes {stable_mosaic.version = 11 : i64} {
  func.func @_critic_packed_kernel(%arg0: i32, %arg1: memref<8x4xf32, #tpu.memory_space<vmem>>, %arg2: memref<4x64xf32, #tpu.memory_space<vmem>>, %arg3: memref<1x64xf32, #tpu.memory_space<vmem>>, %arg4: memref<64x64xf32, #tpu.memory_space<vmem>>, %arg5: memref<1x64xf32, #tpu.memory_space<vmem>>, %arg6: memref<64x2xf32, #tpu.memory_space<vmem>>, %arg7: memref<1x2xf32, #tpu.memory_space<vmem>>, %arg8: memref<8x2xf32, #tpu.memory_space<vmem>>) attributes {dimension_semantics = [#tpu.dimension_semantics<parallel>], iteration_bounds = array<i64: 1>, scalar_prefetch = 0 : i64, scratch_operands = 0 : i64, tpu.core_type = #tpu.core_type<tc>, window_params = [{transform_indices = @transform_0, window_bounds = array<i64: 8, 4>}, {pipeline_mode = #tpu.pipeline_mode<synchronous>, transform_indices = @transform_1, window_bounds = array<i64: 4, 64>}, {pipeline_mode = #tpu.pipeline_mode<synchronous>, transform_indices = @transform_2, window_bounds = array<i64: 1, 64>}, {pipeline_mode = #tpu.pipeline_mode<synchronous>, transform_indices = @transform_3, window_bounds = array<i64: 64, 64>}, {pipeline_mode = #tpu.pipeline_mode<synchronous>, transform_indices = @transform_4, window_bounds = array<i64: 1, 64>}, {pipeline_mode = #tpu.pipeline_mode<synchronous>, transform_indices = @transform_5, window_bounds = array<i64: 64, 2>}, {pipeline_mode = #tpu.pipeline_mode<synchronous>, transform_indices = @transform_6, window_bounds = array<i64: 1, 2>}, {transform_indices = @transform_7, window_bounds = array<i64: 8, 2>}]} {
    %c0 = arith.constant 0 : index
    %c0_0 = arith.constant 0 : index
    %0 = vector.load %arg1[%c0, %c0_0] : memref<8x4xf32, #tpu.memory_space<vmem>>, vector<8x4xf32>
    %c0_1 = arith.constant 0 : index
    %c0_2 = arith.constant 0 : index
    %1 = vector.load %arg2[%c0_1, %c0_2] : memref<4x64xf32, #tpu.memory_space<vmem>>, vector<4x64xf32>
    %cst = arith.constant dense<0.000000e+00> : vector<8x64xf32>
    %2 = tpu.matmul %0, %1, %cst {dimension_numbers = #tpu.dot_dimension_numbers<[1], [0], [0], [1], [0, 0, 1, 1], [], []>} : vector<8x4xf32>, vector<4x64xf32>, vector<8x64xf32> -> vector<8x64xf32>
    %c0_3 = arith.constant 0 : index
    %c0_4 = arith.constant 0 : index
    %3 = vector.load %arg3[%c0_3, %c0_4] : memref<1x64xf32, #tpu.memory_space<vmem>>, vector<1x64xf32>
    %4 = vector.broadcast %3 : vector<1x64xf32> to vector<8x64xf32>
    %5 = arith.addf %2, %4 : vector<8x64xf32>
    %cst_5 = arith.constant 0.000000e+00 : f32
    %6 = vector.broadcast %cst_5 : f32 to vector<8x64xf32>
    %7 = arith.maximumf %5, %6 : vector<8x64xf32>
    %c0_6 = arith.constant 0 : index
    %c0_7 = arith.constant 0 : index
    %8 = vector.load %arg4[%c0_6, %c0_7] : memref<64x64xf32, #tpu.memory_space<vmem>>, vector<64x64xf32>
    %c0_8 = arith.constant 0 : index
    %c0_9 = arith.constant 0 : index
    %9 = vector.load %arg5[%c0_8, %c0_9] : memref<1x64xf32, #tpu.memory_space<vmem>>, vector<1x64xf32>
    %10 = vector.shape_cast %9 : vector<1x64xf32> to vector<1x64xf32>
    %11 = vector.broadcast %10 : vector<1x64xf32> to vector<8x64xf32>
    %cst_10 = arith.constant dense<0.000000e+00> : vector<8x64xf32>
    %12 = tpu.matmul %7, %8, %cst_10 {dimension_numbers = #tpu.dot_dimension_numbers<[1], [0], [0], [1], [0, 0, 1, 1], [], []>} : vector<8x64xf32>, vector<64x64xf32>, vector<8x64xf32> -> vector<8x64xf32>
    %13 = arith.addf %12, %11 : vector<8x64xf32>
    %cst_11 = arith.constant 0.000000e+00 : f32
    %14 = vector.broadcast %cst_11 : f32 to vector<8x64xf32>
    %15 = arith.maximumf %13, %14 : vector<8x64xf32>
    %cst_12 = arith.constant dense<0.000000e+00> : vector<8x64xf32>
    %16 = tpu.matmul %15, %8, %cst_12 {dimension_numbers = #tpu.dot_dimension_numbers<[1], [0], [0], [1], [0, 0, 1, 1], [], []>} : vector<8x64xf32>, vector<64x64xf32>, vector<8x64xf32> -> vector<8x64xf32>
    %17 = arith.addf %16, %11 : vector<8x64xf32>
    %cst_13 = arith.constant 0.000000e+00 : f32
    %18 = vector.broadcast %cst_13 : f32 to vector<8x64xf32>
    %19 = arith.maximumf %17, %18 : vector<8x64xf32>
    %c0_14 = arith.constant 0 : index
    %c0_15 = arith.constant 0 : index
    %20 = vector.load %arg6[%c0_14, %c0_15] : memref<64x2xf32, #tpu.memory_space<vmem>>, vector<64x2xf32>
    %cst_16 = arith.constant dense<0.000000e+00> : vector<8x2xf32>
    %21 = tpu.matmul %19, %20, %cst_16 {dimension_numbers = #tpu.dot_dimension_numbers<[1], [0], [0], [1], [0, 0, 1, 1], [], []>} : vector<8x64xf32>, vector<64x2xf32>, vector<8x2xf32> -> vector<8x2xf32>
    %c0_17 = arith.constant 0 : index
    %c0_18 = arith.constant 0 : index
    %22 = vector.load %arg7[%c0_17, %c0_18] : memref<1x2xf32, #tpu.memory_space<vmem>>, vector<1x2xf32>
    %23 = vector.broadcast %22 : vector<1x2xf32> to vector<8x2xf32>
    %24 = arith.addf %21, %23 : vector<8x2xf32>
    %c0_19 = arith.constant 0 : index
    %c0_20 = arith.constant 0 : index
    %25 = vector.load %arg8[%c0_19, %c0_20] : memref<8x2xf32, #tpu.memory_space<vmem>>, vector<8x2xf32>
    tpu.vector_store %arg8[%c0_19, %c0_20], %24 {strides = array<i32>} : memref<8x2xf32, #tpu.memory_space<vmem>>, vector<8x2xf32>,
    return
  }
  func.func @transform_0(%arg0: i32) -> (i32, i32) {
    %c0_i32 = arith.constant 0 : i32
    %c0_i32_0 = arith.constant 0 : i32
    return %arg0, %c0_i32 : i32, i32
  }
  func.func @transform_1(%arg0: i32) -> (i32, i32) {
    %c0_i32 = arith.constant 0 : i32
    %c0_i32_0 = arith.constant 0 : i32
    %c0_i32_1 = arith.constant 0 : i32
    return %c0_i32, %c0_i32_0 : i32, i32
  }
  func.func @transform_2(%arg0: i32) -> (i32, i32) {
    %c0_i32 = arith.constant 0 : i32
    %c0_i32_0 = arith.constant 0 : i32
    %c0_i32_1 = arith.constant 0 : i32
    return %c0_i32, %c0_i32_0 : i32, i32
  }
  func.func @transform_3(%arg0: i32) -> (i32, i32) {
    %c0_i32 = arith.constant 0 : i32
    %c0_i32_0 = arith.constant 0 : i32
    %c0_i32_1 = arith.constant 0 : i32
    return %c0_i32, %c0_i32_0 : i32, i32
  }
  func.func @transform_4(%arg0: i32) -> (i32, i32) {
    %c0_i32 = arith.constant 0 : i32
    %c0_i32_0 = arith.constant 0 : i32
    %c0_i32_1 = arith.constant 0 : i32
    return %c0_i32, %c0_i32_0 : i32, i32
  }
  func.func @transform_5(%arg0: i32) -> (i32, i32) {
    %c0_i32 = arith.constant 0 : i32
    %c0_i32_0 = arith.constant 0 : i32
    %c0_i32_1 = arith.constant 0 : i32
    return %c0_i32, %c0_i32_0 : i32, i32
  }
  func.func @transform_6(%arg0: i32) -> (i32, i32) {
    %c0_i32 = arith.constant 0 : i32
    %c0_i32_0 = arith.constant 0 : i32
    %c0_i32_1 = arith.constant 0 : i32
    return %c0_i32, %c0_i32_0 : i32, i32
  }
  func.func @transform_7(%arg0: i32) -> (i32, i32) {
    %c0_i32 = arith.constant 0 : i32
    %c0_i32_0 = arith.constant 0 : i32
    return %arg0, %c0_i32 : i32, i32
  }
}

</mosaic_0001>

<bundles_post_ra>
// kernel: critic_forward_packed.1
= control target key start
LH: loop header
LB: loop body
LE: loop exit
PB: predicated region body
PF: predicated region fallthrough
CT: control target
= control target key end

     0   :  { %vm39_vm0 = vcmask 1043456   ;;  %vm35_vm1 = vcmask 31744   ;;  %v473_v0 = vmov 0.0   ;;  %vm474_vm2 = vmmov 0   ;;  %s617_s1 = inlined_call_operand.vmem [shape: f32[4,64], index: 1, kind: input, shape index: {}]   ;;  %s618_s0 = inlined_call_operand.vmem [shape: f32[8,4], index: 0, kind: input, shape index: {}]   ;;  %s619_s3 = inlined_call_operand.vmem [shape: f32[64,64], index: 3, kind: input, shape index: {}]   ;;  %s620_s2 = inlined_call_operand.vmem [shape: f32[1,64], index: 2, kind: input, shape index: {}]   ;;  %s621_s5 = inlined_call_operand.vmem [shape: f32[64,2], index: 5, kind: input, shape index: {}]   ;;  %s622_s4 = inlined_call_operand.vmem [shape: f32[1,64], index: 4, kind: input, shape index: {}]   ;;  %s623_s6 = inlined_call_operand.vmem [shape: f32[1,2], index: 6, kind: input, shape index: {}]   ;;  %s624_s7 = inlined_call_operand.vmem [shape: f32[8,2], index: 7, kind: output, shape index: {}]  }
   0x1   :  { %409 = vmatprep.subr.mxu0 %v473_v0  ;;  %v27_v1 = vld [vmem:[%s617_s1] sm:$0xf]  ;;  %411 = vmatprep.mubr.msk.f32.mxu0 %vm474_vm2, %v473_v0  ;;  %v121_v3 = vld [vmem:[%s619_s3 + $0x38] sm:$0xff]  ;;  %v120_v4 = vld [vmem:[%s619_s3 + $0x30] sm:$0xff]  ;;  %vm129_vm3 = vcmask 523264   ;;  %vm366_vm4 = vcmask 15360  }
   0x2   :  { %v26_v2 = vld [vmem:[%s618_s0] sm:$0xff]  ;;  %410 = vmatpush3.msk.msra.mxu0 %vm39_vm0, %v27_v1  ;;  %414 = vmatprep.subr.mxu1 %v473_v0  ;;  %v119_v5 = vld [vmem:[%s619_s3 + $0x28] sm:$0xff]  ;;  %v117_v7 = vld [vmem:[%s619_s3 + $0x18] sm:$0xff] }
   0x3   :  { %412 = vmatmul.mubr.msk.f32.vlgmr.msra.gmra.mxu0 %vm35_vm1, %v26_v2  ;;  %415 = vmatpush3.msra.mxu1 %v121_v3  ;;  %v118_v6 = vld [vmem:[%s619_s3 + $0x20] sm:$0xff]  ;;  %v116_v8 = vld [vmem:[%s619_s3 + $0x10] sm:$0xff]  ;;  %v115_v9 = vld [vmem:[%s619_s3 + $0x8] sm:$0xff] }
   0x4   :  { %416 = vmatprep.subr.mxu1 %v473_v0  ;;  %430 = vmatprep.mubr.msk.f32.mxu1 %vm474_vm2, %v473_v0  ;;  %v114_v10 = vld [vmem:[%s619_s3] sm:$0xff]  ;;  %v285_v16 = vld [vmem:[%s621_s5 + $0x38] sm:$0xff]  ;;  %v284_v17 = vld [vmem:[%s621_s5 + $0x30] sm:$0xff] }
   0x5   :  { %417 = vmatpush3.msra.mxu1 %v120_v4  ;;  %433 = vmatprep.subr.mxu0 %v473_v0  ;;  %v372_v11 = vld [vmem:[%s620_s2] ss:$0 sm:$0xff]  ;;  %v283_v18 = vld [vmem:[%s621_s5 + $0x28] sm:$0xff]  ;;  %v281_v20 = vld [vmem:[%s621_s5 + $0x18] sm:$0xff] }
   0x6   :  { %418 = vmatprep.subr.mxu1 %v473_v0  ;;  %434 = vmatpush3.msra.mxu0 %v121_v3  ;;  %v282_v19 = vld [vmem:[%s621_s5 + $0x20] sm:$0xff]  ;;  %v280_v26 = vld [vmem:[%s621_s5 + $0x10] sm:$0xff]  ;;  %v279_v27 = vld [vmem:[%s621_s5 + $0x8] sm:$0xff] }
   0x7   :  { %419 = vmatpush3.msra.mxu1 %v119_v5  ;;  %435 = vmatprep.subr.mxu0 %v473_v0  ;;  %v375_v21 = vld [vmem:[%s622_s4] ss:$0 sm:$0xff] }
   0x8   :  { %420 = vmatprep.subr.mxu1 %v473_v0  ;;  %436 = vmatpush3.msra.mxu0 %v120_v4  ;;  %v278_v28 = vld [vmem:[%s621_s5] sm:$0xff] }
   0x9   :  { %421 = vmatpush3.msra.mxu1 %v118_v6  ;;  %437 = vmatprep.subr.mxu0 %v473_v0  ;;  %v378_v33 = vld [vmem:[%s623_s6] ss:$0 sm:$0xff] }
   0xa   :  { %422 = vmatprep.subr.mxu1 %v473_v0  ;;  %438 = vmatpush3.msra.mxu0 %v119_v5 }
   0xb   :  { %423 = vmatpush3.msra.mxu1 %v117_v7  ;;  %439 = vmatprep.subr.mxu0 %v473_v0 }
   0xc   :  { %424 = vmatprep.subr.mxu1 %v473_v0  ;;  %440 = vmatpush3.msra.mxu0 %v118_v6 }
   0xd   :  { %441 = vmatprep.subr.mxu0 %v473_v0  ;;  %449 = vmatprep.mubr.msk.f32.mxu0 %vm474_vm2, %v473_v0 }
   0xe   :  { %442 = vmatpush3.msra.mxu0 %v117_v7  ;;  %425 = vmatpush3.msra.mxu1 %v116_v8 }
   0xf   :  { %443 = vmatprep.subr.mxu0 %v473_v0  ;;  %426 = vmatprep.subr.mxu1 %v473_v0 }
  0x10   :  { %444 = vmatpush3.msra.mxu0 %v116_v8  ;;  %427 = vmatpush3.msra.mxu1 %v115_v9 }
  0x11   :  { %445 = vmatprep.subr.mxu0 %v473_v0  ;;  %428 = vmatprep.subr.mxu1 %v473_v0 }
  0x12   :  { %446 = vmatpush3.msra.mxu0 %v115_v9  ;;  %429 = vmatpush3.msra.mxu1 %v114_v10 }
  0x13   :  { %447 = vmatprep.subr.mxu0 %v473_v0  ;;  %452 = vmatprep.subr.mxu1 %v473_v0 }
  0x14   :  { %448 = vmatpush3.msra.mxu0 %v114_v10 }
  0xc3   :  { %v109_v12 = vpop.f32.mrf.mxu0 }
  0xc4   :  { %v110_v13 = vadd.f32 %v372_v11, %v109_v12 }
  0xc5   :  { %v413_v14 = vpop.f32.mrf.mxu0 }
  0xc6   :  { %v113_v15 = vmax.f32 %v110_v13, 0.0 }
  0xc8   :  { %431 = vmatmul.mubr.msk.f32.vlgmr.msra.gmra.mxu1 %vm129_vm3, %v113_v15 }
  0xc9   :  { %468 = vmatprep.mubr.msk.f32.mxu1 %vm474_vm2, %v473_v0  ;;  %453 = vmatpush3.msra.mxu1 %v285_v16 }
  0xca   :  { %454 = vmatprep.subr.mxu1 %v473_v0 }
  0xcb   :  { %455 = vmatpush3.msra.mxu1 %v284_v17 }
  0xcc   :  { %456 = vmatprep.subr.mxu1 %v473_v0 }
  0xcd   :  { %457 = vmatpush3.msra.mxu1 %v283_v18 }
  0xce   :  { %458 = vmatprep.subr.mxu1 %v473_v0 }
  0xcf   :  { %459 = vmatpush3.msra.mxu1 %v282_v19 }
  0xd0   :  { %460 = vmatprep.subr.mxu1 %v473_v0 }
  0xd1   :  { %461 = vmatpush3.msra.mxu1 %v281_v20 }
  0xd2   :  { %462 = vmatprep.subr.mxu1 %v473_v0 }
  0xd3   :  { %463 = vmatpush3.msra.mxu1 %v280_v26 }
  0xd4   :  { %464 = vmatprep.subr.mxu1 %v473_v0 }
  0xd5   :  { %465 = vmatpush3.msra.mxu1 %v279_v27 }
  0xd6   :  { %466 = vmatprep.subr.mxu1 %v473_v0 }
  0xd7   :  { %467 = vmatpush3.msra.mxu1 %v278_v28 }
 0x188   :  { %v199_v22 = vpop.f32.mrf.mxu1 }
 0x189   :  { %v200_v23 = vadd.f32 %v375_v21, %v199_v22 }
 0x18a   :  { %v432_v24 = vpop.f32.mrf.mxu1 }
 0x18b   :  { %v203_v25 = vmax.f32 %v200_v23, 0.0 }
 0x18d   :  { %450 = vmatmul.mubr.msk.f32.vlgmr.msra.gmra.mxu0 %vm129_vm3, %v203_v25 }
 0x24d   :  { %v273_v29 = vpop.f32.mrf.mxu0 }
 0x24e   :  { %v274_v30 = vadd.f32 %v375_v21, %v273_v29 }
 0x24f   :  { %v451_v31 = vpop.f32.mrf.mxu0 }
 0x250   :  { %v277_v32 = vmax.f32 %v274_v30, 0.0 }
 0x252   :  { %469 = vmatmul.mubr.msk.f32.vlgmr.msra.gmra.mxu1 %vm129_vm3, %v277_v32 }
 0x312   :  { %v362_v34 = vpop.f32.mrf.mxu1 }
 0x313   :  { %v363_v35 = vadd.f32 %v378_v33, %v362_v34 }
 0x314   :  { %v470_v36 = vpop.f32.mrf.mxu1 }
 0x315   :  { %367 = vst.msk [vmem:[%s624_s7] sm:$0xff] %vm366_vm4, %v363_v35 }

</bundles_post_ra>
